<compile_context>
chip_gen: v6e
topology: v6e:2x2x1
jax: 0.10.0
libtpu: 0.0.40
codegen_flags: <defaults>
</compile_context>

<pallas_src>
import jax
import jax.numpy as jnp
from jax.experimental import pallas as pl
from jax.experimental.pallas import tpu as pltpu

LANE = 128
SUBLANE = 8


def _round_up(x, m):
    return (x + m - 1) // m * m


# ---------------------------------------------------------------------------
# Fused kernel: all LSTM layers (layer = grid axis) + final Linear
# ---------------------------------------------------------------------------
def fused_lstm_decoder_kernel(x_ref, h0_ref, c0_ref, w_ref, b_ref,
                              wlin_ref, blin_ref,
                              hn_ref, cn_ref, out_ref,
                              xin_ref):
    """One grid step == one stacked LSTM layer (single timestep).

    x_ref    : (Bp, Kin)        padded decoder input (resident across layers)
    h0_ref   : (Bp, Hp)         this layer's initial hidden state
    c0_ref   : (Bp, Hp)         this layer's initial cell state
    w_ref    : (Kin+Hp, 4*Hp)   this layer's combined [W_ih ; W_hh]^T (bf16)
    b_ref    : (1, 4*Hp)        this layer's combined bias b_ih + b_hh (f32)
    wlin_ref : (Hp, Op)         final Linear weight^T (bf16)
    blin_ref : (1, Op)          final Linear bias (f32)
    hn_ref   : (Bp, Hp)         output hidden state for this layer
    cn_ref   : (Bp, Hp)         output cell state for this layer
    out_ref  : (Bp, Op)         final Linear output (written on last layer only)
    xin_ref  : (Bp, Kin) VMEM   carries this-layer input / next-layer input
    Gate order follows PyTorch: i, f, g, o (each padded to Hp lanes).
    """
    l = pl.program_id(0)
    num_layers = pl.num_programs(0)
    Hp = h0_ref.shape[-1]
    Kin = x_ref.shape[-1]

    # Layer 0 input = x; later layers read the previous layer's h from VMEM scratch.
    @pl.when(l == 0)
    def _():
        xin_ref[...] = x_ref[...]

    h_prev = h0_ref[...]                      # (Bp, Hp) f32
    c_prev = c0_ref[...]                      # (Bp, Hp) f32

    # Single fused MXU matmul: [input ; h_prev] @ Wcat, f32 accumulate.
    xh = jnp.concatenate([xin_ref[...], h_prev], axis=-1).astype(w_ref.dtype)
    gates = jnp.dot(xh, w_ref[...], preferred_element_type=jnp.float32) + b_ref[...]

    # Lane-aligned full-vreg gate slices (each Hp = multiple of 128 lanes).
    i_g = jax.nn.sigmoid(gates[:, 0 * Hp:1 * Hp])
    f_g = jax.nn.sigmoid(gates[:, 1 * Hp:2 * Hp])
    g_g = jnp.tanh(gates[:, 2 * Hp:3 * Hp])
    o_g = jax.nn.sigmoid(gates[:, 3 * Hp:4 * Hp])

    c_new = f_g * c_prev + i_g * g_g
    h_new = o_g * jnp.tanh(c_new)

    hn_ref[...] = h_new
    cn_ref[...] = c_new

    # Carry h to the next layer's input slot (stays in VMEM, no HBM round-trip).
    @pl.when(l + 1 < num_layers)
    def _():
        if Kin == Hp:
            xin_ref[...] = h_new
        else:
            xin_ref[...] = jnp.concatenate(
                [h_new, jnp.zeros((h_new.shape[0], Kin - Hp), jnp.float32)], axis=-1)

    # Final Linear fused into the same kernel, only on the last layer.
    @pl.when(l == num_layers - 1)
    def _():
        out_ref[...] = (jnp.dot(h_new.astype(wlin_ref.dtype), wlin_ref[...],
                                preferred_element_type=jnp.float32)
                        + blin_ref[...])


# ---------------------------------------------------------------------------
# Wrapper
# ---------------------------------------------------------------------------
@jax.jit
def lstm_decoder_forward(packed, x_input, encoder_hidden_states):
    """Pallas implementation of lstm_decoder.forward.

    x_input:               (B, input_size)
    encoder_hidden_states: (h0, c0), each (num_layers, B, hidden_size)
    returns (output, (h_n, c_n)) with output (B, 1, input_size)
    (PyTorch's lstm_out.squeeze(0) is a no-op for B > 1; we keep that behavior.)
    """
    h0, c0 = encoder_hidden_states
    num_layers, B, H = h0.shape
    I = x_input.shape[-1]

    Hp = packed["w_lin"].shape[0]             # padded hidden size
    Op = packed["w_lin"].shape[1]             # padded output size (== padded input_size)
    KHp = packed["w_cat"].shape[1]            # Kin + Hp
    Kin = KHp - Hp
    G = 4 * Hp
    Bp = _round_up(B, SUBLANE)

    # Pad activations / state to (sublane, lane) granularity.
    x_p = jnp.zeros((Bp, Kin), jnp.float32).at[:B, :I].set(x_input.astype(jnp.float32))
    h0_p = jnp.zeros((num_layers, Bp, Hp), jnp.float32).at[:, :B, :H].set(
        h0.astype(jnp.float32))
    c0_p = jnp.zeros((num_layers, Bp, Hp), jnp.float32).at[:, :B, :H].set(
        c0.astype(jnp.float32))

    hn_p, cn_p, out_p = pl.pallas_call(
        fused_lstm_decoder_kernel,
        grid=(num_layers,),
        in_specs=[
            pl.BlockSpec((Bp, Kin), lambda l: (0, 0)),               # x (resident)
            pl.BlockSpec((None, Bp, Hp), lambda l: (l, 0, 0)),       # h0[l]
            pl.BlockSpec((None, Bp, Hp), lambda l: (l, 0, 0)),       # c0[l]
            pl.BlockSpec((None, KHp, G), lambda l: (l, 0, 0)),       # Wcat[l]
            pl.BlockSpec((None, 1, G), lambda l: (l, 0, 0)),         # bias[l]
            pl.BlockSpec((Hp, Op), lambda l: (0, 0)),                # W_lin (resident)
            pl.BlockSpec((1, Op), lambda l: (0, 0)),                 # b_lin (resident)
        ],
        out_specs=(
            pl.BlockSpec((None, Bp, Hp), lambda l: (l, 0, 0)),       # h_n[l]
            pl.BlockSpec((None, Bp, Hp), lambda l: (l, 0, 0)),       # c_n[l]
            pl.BlockSpec((Bp, Op), lambda l: (0, 0)),                # linear output
        ),
        out_shape=(
            jax.ShapeDtypeStruct((num_layers, Bp, Hp), jnp.float32),
            jax.ShapeDtypeStruct((num_layers, Bp, Hp), jnp.float32),
            jax.ShapeDtypeStruct((Bp, Op), jnp.float32),
        ),
        scratch_shapes=[pltpu.VMEM((Bp, Kin), jnp.float32)],
        # h0 -> h_n, c0 -> c_n updated in place (same shape/dtype).
        input_output_aliases={1: 0, 2: 1},
        compiler_params=pltpu.CompilerParams(
            dimension_semantics=("arbitrary",)),                     # layers are sequential
    )(x_p, h0_p, c0_p, packed["w_cat"], packed["b_cat"],
      packed["w_lin"], packed["b_lin"])

    h_n = hn_p[:, :B, :H]
    c_n = cn_p[:, :B, :H]
    output = out_p[:B, :I][:, None, :]        # (B, 1, input_size)
    return output, (h_n, c_n)


# ---------------------------------------------------------------------------
# Parameter init (PyTorch layout) and one-time packing for the fused kernel
# ---------------------------------------------------------------------------
def init_params(key, input_size, hidden_size, num_layers):
    """PyTorch nn.LSTM / nn.Linear layout, uniform(-1/sqrt(H), 1/sqrt(H)) init."""
    bound = 1.0 / (hidden_size ** 0.5)
    lstm = []
    for layer in range(num_layers):
        in_sz = input_size if layer == 0 else hidden_size
        key, k1, k2, k3, k4 = jax.random.split(key, 5)
        w_ih = jax.random.uniform(k1, (4 * hidden_size, in_sz), jnp.float32, -bound, bound)
        w_hh = jax.random.uniform(k2, (4 * hidden_size, hidden_size), jnp.float32, -bound, bound)
        b_ih = jax.random.uniform(k3, (4 * hidden_size,), jnp.float32, -bound, bound)
        b_hh = jax.random.uniform(k4, (4 * hidden_size,), jnp.float32, -bound, bound)
        lstm.append((w_ih, w_hh, b_ih, b_hh))
    key, k1, k2 = jax.random.split(key, 3)
    w_lin = jax.random.uniform(k1, (input_size, hidden_size), jnp.float32, -bound, bound)
    b_lin = jax.random.uniform(k2, (input_size,), jnp.float32, -bound, bound)
    return {"lstm": lstm, "linear": (w_lin, b_lin)}


def pack_params(raw, input_size, hidden_size, weight_dtype=jnp.bfloat16):
    """One-time packing: pad to (8,128) granularity, fuse [W_ih;W_hh], stack layers.

    weight_dtype=bfloat16 halves weight HBM traffic (v6e/v7x MXU is bf16-native);
    biases stay f32 (added after the f32-accumulated matmul).
    """
    I, H = input_size, hidden_size
    Hp = _round_up(H, LANE)
    Kin = max(_round_up(I, LANE), Hp)         # width of the "layer input" slot
    Op = _round_up(I, LANE)

    def pad_gates(w, cols_to):
        # (4H, cols) -> pad each PyTorch gate block (i,f,g,o) to Hp rows -> (4*Hp, cols_to)
        cols = w.shape[1]
        w4 = w.reshape(4, H, cols)
        w4 = jnp.pad(w4, ((0, 0), (0, Hp - H), (0, cols_to - cols)))
        return w4.reshape(4 * Hp, cols_to)

    w_cat, b_cat = [], []
    for (w_ih, w_hh, b_ih, b_hh) in raw["lstm"]:
        w_ih_p = pad_gates(w_ih, Kin)                               # (4Hp, Kin)
        w_hh_p = pad_gates(w_hh, Hp)                                # (4Hp, Hp)
        w_cat.append(jnp.concatenate([w_ih_p.T, w_hh_p.T], axis=0))  # (Kin+Hp, 4Hp)
        b = (b_ih + b_hh).reshape(4, H)
        b = jnp.pad(b, ((0, 0), (0, Hp - H))).reshape(1, 4 * Hp)
        b_cat.append(b)

    w_lin, b_lin = raw["linear"]                                    # (I, H), (I,)
    w_lin_p = jnp.pad(w_lin, ((0, Op - I), (0, Hp - H))).T          # (Hp, Op)
    b_lin_p = jnp.pad(b_lin, (0, Op - I))[None, :]                  # (1, Op)

    return {
        "w_cat": jnp.stack(w_cat, axis=0).astype(weight_dtype),     # (L, Kin+Hp, 4Hp)
        "b_cat": jnp.stack(b_cat, axis=0).astype(jnp.float32),      # (L, 1, 4Hp)
        "w_lin": w_lin_p.astype(weight_dtype),                      # (Hp, Op)
        "b_lin": b_lin_p.astype(jnp.float32),                       # (1, Op)
    }


# ---------------------------------------------------------------------------
# Pure-JAX reference (for correctness check)
# ---------------------------------------------------------------------------
def reference_forward(raw, x_input, encoder_hidden_states, matmul_dtype=jnp.float32):
    """Reference. matmul_dtype mirrors the kernel's weight/activation matmul dtype."""
    h0, c0 = encoder_hidden_states
    H = h0.shape[-1]

    def q(a):  # quantize matmul operands like the kernel, compute in f32
        return a.astype(matmul_dtype).astype(jnp.float32)

    layer_in = x_input
    h_list, c_list = [], []
    for layer, (w_ih, w_hh, b_ih, b_hh) in enumerate(raw["lstm"]):
        gates = q(layer_in) @ q(w_ih).T + q(h0[layer]) @ q(w_hh).T + (b_ih + b_hh)
        i = jax.nn.sigmoid(gates[:, 0 * H:1 * H])
        f = jax.nn.sigmoid(gates[:, 1 * H:2 * H])
        g = jnp.tanh(gates[:, 2 * H:3 * H])
        o = jax.nn.sigmoid(gates[:, 3 * H:4 * H])
        c_new = f * c0[layer] + i * g
        h_new = o * jnp.tanh(c_new)
        h_list.append(h_new)
        c_list.append(c_new)
        layer_in = h_new
    w_lin, b_lin = raw["linear"]
    out = (q(h_list[-1]) @ q(w_lin).T + b_lin)[:, None, :]
    return out, (jnp.stack(h_list, 0), jnp.stack(c_list, 0))


# ---------------------------------------------------------------------------
if __name__ == "__main__":
    batch = 2
    input_size = 8
    hidden_size = 32
    num_layers = 2

    key = jax.random.PRNGKey(0)
    key, kx, kh, kc = jax.random.split(key, 4)
    raw_params = init_params(key, input_size, hidden_size, num_layers)
    packed = pack_params(raw_params, input_size, hidden_size, weight_dtype=jnp.bfloat16)

    x_input = jax.random.normal(kx, (batch, input_size), jnp.float32)
    h0 = jax.random.normal(kh, (num_layers, batch, hidden_size), jnp.float32)
    c0 = jax.random.normal(kc, (num_layers, batch, hidden_size), jnp.float32)

    output, (h_n, c_n) = lstm_decoder_forward(packed, x_input, (h0, c0))
    jax.block_until_ready((output, h_n, c_n))

    # Reference mirroring the kernel's bf16 weight/activation quantization (tight).
    ref_out, (ref_h, ref_c) = reference_forward(raw_params, x_input, (h0, c0), jnp.bfloat16)
    # Full-f32 reference (original PyTorch semantics), loose sanity tolerance.
    f32_out, (f32_h, f32_c) = reference_forward(raw_params, x_input, (h0, c0), jnp.float32)

    assert output.shape == (batch, 1, input_size)
    assert h_n.shape == (num_layers, batch, hidden_size)
    assert c_n.shape == (num_layers, batch, hidden_size)

    assert jnp.allclose(output, ref_out, atol=1e-4), float(jnp.max(jnp.abs(output - ref_out)))
    assert jnp.allclose(h_n, ref_h, atol=1e-4), float(jnp.max(jnp.abs(h_n - ref_h)))
    assert jnp.allclose(c_n, ref_c, atol=1e-4), float(jnp.max(jnp.abs(c_n - ref_c)))

    assert jnp.allclose(output, f32_out, atol=5e-2)
    assert jnp.allclose(h_n, f32_h, atol=5e-2)
    assert jnp.allclose(c_n, f32_c, atol=5e-2)

    print("KERNEL_OK")
</pallas_src>

<mosaic_0001>
module attributes {stable_mosaic.version = 11 : i64} {
  func.func @fused_lstm_decoder_kernel(%arg0: i32, %arg1: memref<8x128xf32, #tpu.memory_space<vmem>>, %arg2: memref<1x8x128xf32, #tpu.memory_space<vmem>>, %arg3: memref<1x8x128xf32, #tpu.memory_space<vmem>>, %arg4: memref<1x256x512xbf16, #tpu.memory_space<vmem>>, %arg5: memref<1x1x512xf32, #tpu.memory_space<vmem>>, %arg6: memref<128x128xbf16, #tpu.memory_space<vmem>>, %arg7: memref<1x128xf32, #tpu.memory_space<vmem>>, %arg8: memref<1x8x128xf32, #tpu.memory_space<vmem>>, %arg9: memref<1x8x128xf32, #tpu.memory_space<vmem>>, %arg10: memref<8x128xf32, #tpu.memory_space<vmem>>, %arg11: memref<8x128xf32, #tpu.memory_space<vmem>>) attributes {dimension_semantics = [#tpu.dimension_semantics<arbitrary>], iteration_bounds = array<i64: 2>, scalar_prefetch = 0 : i64, scratch_operands = 1 : i64, tpu.core_type = #tpu.core_type<tc>, window_params = [{pipeline_mode = #tpu.pipeline_mode<synchronous>, transform_indices = @transform_0, window_bounds = array<i64: 8, 128>}, {transform_indices = @transform_1, window_bounds = array<i64: 1, 8, 128>}, {transform_indices = @transform_2, window_bounds = array<i64: 1, 8, 128>}, {transform_indices = @transform_3, window_bounds = array<i64: 1, 256, 512>}, {transform_indices = @transform_4, window_bounds = array<i64: 1, 1, 512>}, {pipeline_mode = #tpu.pipeline_mode<synchronous>, transform_indices = @transform_5, window_bounds = array<i64: 128, 128>}, {pipeline_mode = #tpu.pipeline_mode<synchronous>, transform_indices = @transform_6, window_bounds = array<i64: 1, 128>}, {transform_indices = @transform_7, window_bounds = array<i64: 1, 8, 128>}, {transform_indices = @transform_8, window_bounds = array<i64: 1, 8, 128>}, {pipeline_mode = #tpu.pipeline_mode<synchronous>, transform_indices = @transform_9, window_bounds = array<i64: 8, 128>}]} {
    %c0_i32 = arith.constant 0 : i32
    %0 = arith.cmpi eq, %arg0, %c0_i32 : i32
    %1 = arith.extui %0 : i1 to i32
    %c0_i32_0 = arith.constant 0 : i32
    %2 = arith.cmpi ne, %1, %c0_i32_0 : i32
    scf.if %2 {
      %c0_26 = arith.constant 0 : index
      %c0_27 = arith.constant 0 : index
      %55 = vector.load %arg1[%c0_26, %c0_27] : memref<8x128xf32, #tpu.memory_space<vmem>>, vector<8x128xf32>
      %c0_28 = arith.constant 0 : index
      %c0_29 = arith.constant 0 : index
      %56 = vector.load %arg11[%c0_28, %c0_29] : memref<8x128xf32, #tpu.memory_space<vmem>>, vector<8x128xf32>
      tpu.vector_store %arg11[%c0_28, %c0_29], %55 {strides = array<i32>} : memref<8x128xf32, #tpu.memory_space<vmem>>, vector<8x128xf32>,
    } else {
    }
    %c0 = arith.constant 0 : index
    %c0_1 = arith.constant 0 : index
    %c0_2 = arith.constant 0 : index
    %3 = vector.load %arg2[%c0, %c0_1, %c0_2] : memref<1x8x128xf32, #tpu.memory_space<vmem>>, vector<1x8x128xf32>
    %4 = vector.shape_cast %3 : vector<1x8x128xf32> to vector<8x128xf32>
    %c0_3 = arith.constant 0 : index
    %c0_4 = arith.constant 0 : index
    %c0_5 = arith.constant 0 : index
    %5 = vector.load %arg3[%c0_3, %c0_4, %c0_5] : memref<1x8x128xf32, #tpu.memory_space<vmem>>, vector<1x8x128xf32>
    %6 = vector.shape_cast %5 : vector<1x8x128xf32> to vector<8x128xf32>
    %c0_6 = arith.constant 0 : index
    %c0_7 = arith.constant 0 : index
    %7 = vector.load %arg11[%c0_6, %c0_7] : memref<8x128xf32, #tpu.memory_space<vmem>>, vector<8x128xf32>
    %8 = tpu.concatenate %7, %4 in 1 : vector<8x128xf32>, vector<8x128xf32> -> vector<8x256xf32>
    %9 = arith.truncf %8 : vector<8x256xf32> to vector<8x256xbf16>
    %c0_8 = arith.constant 0 : index
    %c0_9 = arith.constant 0 : index
    %c0_10 = arith.constant 0 : index
    %10 = vector.load %arg4[%c0_8, %c0_9, %c0_10] : memref<1x256x512xbf16, #tpu.memory_space<vmem>>, vector<1x256x512xbf16>
    %11 = vector.shape_cast %10 : vector<1x256x512xbf16> to vector<256x512xbf16>
    %cst = arith.constant dense<0.000000e+00> : vector<8x512xf32>
    %12 = tpu.matmul %9, %11, %cst {dimension_numbers = #tpu.dot_dimension_numbers<[1], [0], [0], [1], [0, 0, 1, 1], [], []>} : vector<8x256xbf16>, vector<256x512xbf16>, vector<8x512xf32> -> vector<8x512xf32>
    %c0_11 = arith.constant 0 : index
    %c0_12 = arith.constant 0 : index
    %c0_13 = arith.constant 0 : index
    %13 = vector.load %arg5[%c0_11, %c0_12, %c0_13] : memref<1x1x512xf32, #tpu.memory_space<vmem>>, vector<1x1x512xf32>
    %14 = vector.shape_cast %13 : vector<1x1x512xf32> to vector<1x512xf32>
    %15 = vector.broadcast %14 : vector<1x512xf32> to vector<8x512xf32>
    %16 = arith.addf %12, %15 : vector<8x512xf32>
    %17 = vector.extract_strided_slice %16 {offsets = [0, 0], sizes = [8, 128], strides = [1, 1]} : vector<8x512xf32> to vector<8x128xf32>
    %18 = arith.negf %17 : vector<8x128xf32>
    %19 = math.exp %18 : vector<8x128xf32>
    %cst_14 = arith.constant 1.000000e+00 : f32
    %20 = vector.broadcast %cst_14 : f32 to vector<8x128xf32>
    %21 = arith.addf %20, %19 : vector<8x128xf32>
    %22 = arith.divf %20, %21 : vector<8x128xf32>
    %23 = vector.extract_strided_slice %16 {offsets = [0, 128], sizes = [8, 128], strides = [1, 1]} : vector<8x512xf32> to vector<8x128xf32>
    %24 = arith.negf %23 : vector<8x128xf32>
    %25 = math.exp %24 : vector<8x128xf32>
    %cst_15 = arith.constant 1.000000e+00 : f32
    %26 = vector.broadcast %cst_15 : f32 to vector<8x128xf32>
    %27 = arith.addf %26, %25 : vector<8x128xf32>
    %28 = arith.divf %26, %27 : vector<8x128xf32>
    %29 = vector.extract_strided_slice %16 {offsets = [0, 256], sizes = [8, 128], strides = [1, 1]} : vector<8x512xf32> to vector<8x128xf32>
    %30 = math.tanh %29 : vector<8x128xf32>
    %31 = vector.extract_strided_slice %16 {offsets = [0, 384], sizes = [8, 128], strides = [1, 1]} : vector<8x512xf32> to vector<8x128xf32>
    %32 = arith.negf %31 : vector<8x128xf32>
    %33 = math.exp %32 : vector<8x128xf32>
    %cst_16 = arith.constant 1.000000e+00 : f32
    %34 = vector.broadcast %cst_16 : f32 to vector<8x128xf32>
    %35 = arith.addf %34, %33 : vector<8x128xf32>
    %36 = arith.divf %34, %35 : vector<8x128xf32>
    %37 = arith.mulf %28, %6 : vector<8x128xf32>
    %38 = arith.mulf %22, %30 : vector<8x128xf32>
    %39 = arith.addf %37, %38 : vector<8x128xf32>
    %40 = math.tanh %39 : vector<8x128xf32>
    %41 = arith.mulf %36, %40 : vector<8x128xf32>
    %c0_17 = arith.constant 0 : index
    %c0_18 = arith.constant 0 : index
    %c0_19 = arith.constant 0 : index
    %42 = vector.load %arg8[%c0_17, %c0_18, %c0_19] : memref<1x8x128xf32, #tpu.memory_space<vmem>>, vector<1x8x128xf32>
    %43 = vector.shape_cast %42 : vector<1x8x128xf32> to vector<8x128xf32>
    %44 = vector.shape_cast %41 : vector<8x128xf32> to vector<1x8x128xf32>
    tpu.vector_store %arg8[%c0_17, %c0_18, %c0_19], %44 {strides = array<i32>} : memref<1x8x128xf32, #tpu.memory_space<vmem>>, vector<1x8x128xf32>,
    %c0_20 = arith.constant 0 : index
    %c0_21 = arith.constant 0 : index
    %c0_22 = arith.constant 0 : index
    %45 = vector.load %arg9[%c0_20, %c0_21, %c0_22] : memref<1x8x128xf32, #tpu.memory_space<vmem>>, vector<1x8x128xf32>
    %46 = vector.shape_cast %45 : vector<1x8x128xf32> to vector<8x128xf32>
    %47 = vector.shape_cast %39 : vector<8x128xf32> to vector<1x8x128xf32>
    tpu.vector_store %arg9[%c0_20, %c0_21, %c0_22], %47 {strides = array<i32>} : memref<1x8x128xf32, #tpu.memory_space<vmem>>, vector<1x8x128xf32>,
    %c1_i32 = arith.constant 1 : i32
    %48 = arith.addi %arg0, %c1_i32 : i32
    %c2_i32 = arith.constant 2 : i32
    %49 = arith.cmpi slt, %48, %c2_i32 : i32
    %50 = arith.extui %49 : i1 to i32
    %c0_i32_23 = arith.constant 0 : i32
    %51 = arith.cmpi ne, %50, %c0_i32_23 : i32
    scf.if %51 {
      %c0_26 = arith.constant 0 : index
      %c0_27 = arith.constant 0 : index
      %55 = vector.load %arg11[%c0_26, %c0_27] : memref<8x128xf32, #tpu.memory_space<vmem>>, vector<8x128xf32>
      tpu.vector_store %arg11[%c0_26, %c0_27], %41 {strides = array<i32>} : memref<8x128xf32, #tpu.memory_space<vmem>>, vector<8x128xf32>,
    } else {
    }
    %c1_i32_24 = arith.constant 1 : i32
    %52 = arith.cmpi eq, %arg0, %c1_i32_24 : i32
    %53 = arith.extui %52 : i1 to i32
    %c0_i32_25 = arith.constant 0 : i32
    %54 = arith.cmpi ne, %53, %c0_i32_25 : i32
    scf.if %54 {
      %55 = arith.truncf %41 : vector<8x128xf32> to vector<8x128xbf16>
      %c0_26 = arith.constant 0 : index
      %c0_27 = arith.constant 0 : index
      %56 = vector.load %arg6[%c0_26, %c0_27] : memref<128x128xbf16, #tpu.memory_space<vmem>>, vector<128x128xbf16>
      %cst_28 = arith.constant dense<0.000000e+00> : vector<8x128xf32>
      %57 = tpu.matmul %55, %56, %cst_28 {dimension_numbers = #tpu.dot_dimension_numbers<[1], [0], [0], [1], [0, 0, 1, 1], [], []>} : vector<8x128xbf16>, vector<128x128xbf16>, vector<8x128xf32> -> vector<8x128xf32>
      %c0_29 = arith.constant 0 : index
      %c0_30 = arith.constant 0 : index
      %58 = vector.load %arg7[%c0_29, %c0_30] : memref<1x128xf32, #tpu.memory_space<vmem>>, vector<1x128xf32>
      %59 = vector.broadcast %58 : vector<1x128xf32> to vector<8x128xf32>
      %60 = arith.addf %57, %59 : vector<8x128xf32>
      %c0_31 = arith.constant 0 : index
      %c0_32 = arith.constant 0 : index
      %61 = vector.load %arg10[%c0_31, %c0_32] : memref<8x128xf32, #tpu.memory_space<vmem>>, vector<8x128xf32>
      tpu.vector_store %arg10[%c0_31, %c0_32], %60 {strides = array<i32>} : memref<8x128xf32, #tpu.memory_space<vmem>>, vector<8x128xf32>,
    } else {
    }
    return
  }
  func.func @transform_0(%arg0: i32) -> (i32, i32) {
    %c0_i32 = arith.constant 0 : i32
    %c0_i32_0 = arith.constant 0 : i32
    %c0_i32_1 = arith.constant 0 : i32
    return %c0_i32, %c0_i32_0 : i32, i32
  }
  func.func @transform_1(%arg0: i32) -> (i32, i32, i32) {
    %c0_i32 = arith.constant 0 : i32
    %c0_i32_0 = arith.constant 0 : i32
    %c0_i32_1 = arith.constant 0 : i32
    return %arg0, %c0_i32, %c0_i32_0 : i32, i32, i32
  }
  func.func @transform_2(%arg0: i32) -> (i32, i32, i32) {
    %c0_i32 = arith.constant 0 : i32
    %c0_i32_0 = arith.constant 0 : i32
    %c0_i32_1 = arith.constant 0 : i32
    return %arg0, %c0_i32, %c0_i32_0 : i32, i32, i32
  }
  func.func @transform_3(%arg0: i32) -> (i32, i32, i32) {
    %c0_i32 = arith.constant 0 : i32
    %c0_i32_0 = arith.constant 0 : i32
    %c0_i32_1 = arith.constant 0 : i32
    return %arg0, %c0_i32, %c0_i32_0 : i32, i32, i32
  }
  func.func @transform_4(%arg0: i32) -> (i32, i32, i32) {
    %c0_i32 = arith.constant 0 : i32
    %c0_i32_0 = arith.constant 0 : i32
    %c0_i32_1 = arith.constant 0 : i32
    return %arg0, %c0_i32, %c0_i32_0 : i32, i32, i32
  }
  func.func @transform_5(%arg0: i32) -> (i32, i32) {
    %c0_i32 = arith.constant 0 : i32
    %c0_i32_0 = arith.constant 0 : i32
    %c0_i32_1 = arith.constant 0 : i32
    return %c0_i32, %c0_i32_0 : i32, i32
  }
  func.func @transform_6(%arg0: i32) -> (i32, i32) {
    %c0_i32 = arith.constant 0 : i32
    %c0_i32_0 = arith.constant 0 : i32
    %c0_i32_1 = arith.constant 0 : i32
    return %c0_i32, %c0_i32_0 : i32, i32
  }
  func.func @transform_7(%arg0: i32) -> (i32, i32, i32) {
    %c0_i32 = arith.constant 0 : i32
    %c0_i32_0 = arith.constant 0 : i32
    %c0_i32_1 = arith.constant 0 : i32
    return %arg0, %c0_i32, %c0_i32_0 : i32, i32, i32
  }
  func.func @transform_8(%arg0: i32) -> (i32, i32, i32) {
    %c0_i32 = arith.constant 0 : i32
    %c0_i32_0 = arith.constant 0 : i32
    %c0_i32_1 = arith.constant 0 : i32
    return %arg0, %c0_i32, %c0_i32_0 : i32, i32, i32
  }
  func.func @transform_9(%arg0: i32) -> (i32, i32) {
    %c0_i32 = arith.constant 0 : i32
    %c0_i32_0 = arith.constant 0 : i32
    %c0_i32_1 = arith.constant 0 : i32
    return %c0_i32, %c0_i32_0 : i32, i32
  }
}

</mosaic_0001>

<bundles_post_ra>
// kernel: lstm_decoder_forward.1
= control target key start
LH: loop header
LB: loop body
LE: loop exit
PB: predicated region body
PF: predicated region fallthrough
CT: control target
= control target key end

     0   :  { %s1925_s0 = inlined_call_operand.vmem [shape: f32[8,128], index: 0, kind: input, shape index: {}]   ;;  %s1926_s1 = inlined_call_operand.vmem [shape: f32[2,8,128], index: 1, kind: input, shape index: {}, may-alias: {1,7}]   ;;  %s1927_s2 = inlined_call_operand.vmem [shape: f32[2,8,128], index: 2, kind: input, shape index: {}, may-alias: {2,8}]   ;;  %s1928_s3 = inlined_call_operand.hbm [shape: bf16[2,256,512], index: 3, kind: input, shape index: {}]   ;;  %s1929_s4 = inlined_call_operand.vmem [shape: f32[2,1,512], index: 4, kind: input, shape index: {}]   ;;  %s1930_s5 = inlined_call_operand.hbm [shape: bf16[128,128], index: 5, kind: input, shape index: {}]   ;;  %s1931_s6 = inlined_call_operand.vmem [shape: f32[1,128], index: 6, kind: input, shape index: {}]   ;;  %s1932_s7 = inlined_call_operand.vmem [shape: f32[2,8,128], index: 7, kind: output, shape index: {0}, may-alias: {1,7}]   ;;  %s1933_s8 = inlined_call_operand.vmem [shape: f32[2,8,128], index: 8, kind: output, shape index: {1}, may-alias: {2,8}]   ;;  %s1934_s9 = inlined_call_operand.vmem [shape: f32[8,128], index: 9, kind: output, shape index: {2}]  }
   0x1   :  { %1940 = sst [smem:[#allocation10_spill]] %s1928_s3 }
   0x2   :  { %15 = vsyncpa [#allocation4], 0 }
   0x3   :  { %17 = vsyncpa [#allocation4 + $0x1], 0 }
   0x4   :  { %18 = vsyncpa [#allocation6], 0  ;;  %s1676_s30 = smov 0   ;;  %s1678_s10 = smov 0  }
   0x5   :  { %s1680_s11 = smov 0   ;;  %s1682_s12 = smov 0  }
   0x6 LB: > { %s1695_s13 = sadd.s32 4294967295, %s1616_s12   ;;  %p117_p0 = scmp.ne.s32.totalorder %s1608_s10, %s1604_s30  ;;  %s1616_s12 = sphi %s1682_s12, %s1952_s12   ;;  %s1612_s11 = sphi %s1680_s11, %s1955_s11   ;;  %s1608_s10 = sphi %s1678_s10, %s1954_s10   ;;  %s1604_s30 = sphi %s1676_s30, %s1953_s30  }
   0x7   : > { %p1937_p1 = scmp.eq.s32.totalorder %s1695_s13, 0  ;;  %p1223_p2 = scmp.ge.s32.totalorder %s1616_s12, 1 }
   0x8   : > { %p269_p3 = scmp.lt.s32.totalorder %s1616_s12, 3  ;;  %s1618_s16 = smov [#allocation5]  }
   0x9   : > { %p1704_p5 = por %p1937_p1, %p117_p0  ;;  %s284_s17 = sshll.u32 %s1618_s16, 4  ;;  %s285_s17 = int_to_ptr.vmem [resolvable:$true] %s284_s17 }
   0xa   : > { %p1708_p6 = pnand %p1223_p2, %p269_p3  ;;  %s1721_s19 = sadd.s32 1, %s1616_s12  }
   0xb   : > { %s1941_s14 = scalar_select %p1704_p5, 1, 0 }
   0xc   : > { %s1942_s15 = scalar_select %p1708_p6, 1, 0 }
   0xd   : > { %p1354_p7 = pneg %p1708_p6  ;;  %1944 = sst [smem:[#allocation9_spill]] %s1721_s19 }
   0xe   : > { %s104_s20 = sadd.s32 1, %s1612_s11  ;;  %s101_s21 = ssub.s32 %s1616_s12, %s1721_s19 }
   0xf   : > { %p1716_p8 = pnand %p1354_p7, %p1937_p1  ;;  %s1535_s22 = scalar_lea.vmem %s285_s17, 1024 }
  0x10   : > { %p1536_p10 = scmp.ne.s32.totalorder %s285_s17, %s1535_s22  ;;  %p1543_p13 = scmp.lt.s32.totalorder %s285_s17, %s285_s17 }
  0x11   : > { %p1526_p9 = pneg %p1716_p8  ;;  %p1544_p0 = scmp.lt.s32.totalorder %s1535_s22, %s1535_s22 }
  0x13   : > { %p1538_p11 = pnand %p1536_p10, %p1526_p9  ;;  %p1545_p2 = por %p1544_p0, %p1543_p13 }
  0x15   : > { %p1539_p12 = pneg %p1538_p11 }
  0x17   : > { %p1546_p3 = pnand %p1545_p2, %p1539_p12 }
  0x19   : > { %1549 = shalt.err (!%p1546_p3)
}
  0x1a   : > { %s1619_s23 = smov 64   ;;  %s1620_s24 = smov 4  }
  0x1b   : > { %1357 = dma.hbm_to_vmem [thread:$0]  (!%p1716_p8), %s1930_s5, 1024, %s285_s17, [#allocation6], %s1619_s23, %s1619_s23, %s1620_s24  }
  0x1c   : > { %p102_p7 = scmp.eq.s32.totalorder %s101_s21, 0  ;;  %p111_p9 = scmp.ne.s32.totalorder %s1612_s11, %s1608_s10 }
  0x1d   : > { %p112_p10 = scmp.eq.s32.totalorder %s1616_s12, 0  ;;  %p1363_p11 = scmp.lt.s32.totalorder %s1616_s12, 2 }
  0x1e   : > { %s1738_s27 = scalar_select %p102_p7, %s1612_s11, %s104_s20  }
  0x1f   : > { %p113_p12 = por %p112_p10, %p111_p9  ;;  %s315_s28 = sand.u32 1, %s1612_s11  }
  0x20   : > { %s1226_s29 = sshll.u32 %s315_s28, 9  ;;  %s1318_s30 = sshll.u32 %s1616_s12, 13 }
  0x21   : > { %s1945_s3 = sld [smem:[#allocation10_spill]]  ;;  %s319_s18 = scalar_lea.vmem [#allocation3], %s1226_s29 }
  0x22   : > { %s326_s17 = sshll.u32 %s319_s18, 4  ;;  %p1749_p8 = pnand %p1363_p11, %p113_p12  ;;  %s1747_s17 = int_to_ptr.vmem [resolvable:$true] %s326_s17 }
  0x23   : > { %s1753_s20 = scalar_lea.sflag [#allocation4], %s315_s28 }
  0x24   : > { %p1552_p0 = pneg %p1749_p8 }
  0x27   : > { %s1745_s19 = scalar_lea.hbm %s1945_s3, %s1318_s30  ;;  %s1555_s25 = scalar_lea.hbm %s1945_s3, 16384 }
  0x28   : > { %s1550_s12 = scalar_lea.hbm %s1745_s19, 8192  ;;  %p1556_p7 = scmp.lt.s32.totalorder %s1745_s19, %s1945_s3 }
  0x29   : > { %p1551_p13 = scmp.ne.s32.totalorder %s1745_s19, %s1550_s12  ;;  %p1557_p9 = scmp.lt.s32.totalorder %s1555_s25, %s1550_s12 }
  0x2b   : > { %p1553_p2 = pnand %p1552_p0, %p1551_p13  ;;  %p1558_p10 = por %p1557_p9, %p1556_p7 }
  0x2d   : > { %p1554_p3 = pneg %p1553_p2 }
  0x2f   : > { %p1559_p11 = pnand %p1558_p10, %p1554_p3 }
  0x31   : > { %1562 = shalt.err (!%p1559_p11)
}
  0x32   : > { %s1563_s28 = scalar_lea.vmem %s1747_s17, 8192  ;;  %s1621_s30 = smov [#allocation3]  }
  0x33   : > { %p1564_p12 = scmp.ne.s32.totalorder %s1747_s17, %s1563_s28  ;;  %s1568_s16 = sshll.u32 %s1621_s30, 4  ;;  %s1569_s16 = int_to_ptr.vmem [resolvable:$false] %s1568_s16 }
  0x34   : > { %s1570_s22 = scalar_lea.vmem %s1569_s16, 16384  ;;  %p1571_p2 = scmp.lt.s32.totalorder %s1747_s17, %s1569_s16 }
  0x35   : > { %p1566_p4 = pnand %p1564_p12, %p1552_p0  ;;  %p1572_p1 = scmp.lt.s32.totalorder %s1570_s22, %s1563_s28 }
  0x37   : > { %p1567_p13 = pneg %p1566_p4  ;;  %p1573_p5 = por %p1572_p1, %p1571_p2 }
  0x39   : > { %p1574_p6 = pnand %p1573_p5, %p1567_p13 }
  0x3b   : > { %1577 = shalt.err (!%p1574_p6)
}
  0x3c   : > { %s1622_s18 = smov 256   ;;  %s1623_s12 = smov 16  }
  0x3d   : > { %1361 = dma.hbm_to_vmem [thread:$0]  (!%p1749_p8), %s1745_s19, 8192, %s1747_s17, %s1753_s20, %s1622_s18, %s1622_s18, %s1623_s12  }
  0x3e   : > { %p1947_p0 = scmp.ne.s32.totalorder %s1942_s15, 0 }
  0x3f   : > { %s347_s23 = sand.u32 (!%p1947_p0), 1, %s1608_s10   ;;  %p1948_p1 = scmp.ne.s32.totalorder (!%p1947_p0), %s1941_s14, 0 }
  0x40   : > { %345 = sbr.rel (%p1947_p0) target bundleno = 638 (0x27e), region = 48  ;;  %s1230_s24 = sshll.u32 (!%p1947_p0), %s347_s23, 9 }
  0x41   : > { %s348_s25 = scalar_lea.sflag (!%p1947_p0), [#allocation4], %s347_s23  ;;  %s1777_s26 = scalar_lea.vmem (!%p1947_p0), [#allocation3], %s1230_s24 }
  0x45   : > { %1595 = dma.done.wait (%p1948_p1), %s348_s25, 8192  }
  0x46   : > { %1597 = vsyncadd (%p1948_p1), %s348_s25, 4294959104  ;;  %p1949_p4 = scmp.eq.s32.totalorder %s1695_s13, 0 }
  0x48   : > { %1599 = dma.done.wait (%p1949_p4), [#allocation6], 1024   ;;  %p1950_p5 = pmov %p1949_p4 }
  0x49   : > { %p405_p6 = scmp.lt.s32.totalorder %s1695_s13, 1  ;;  %p1951_p8 = scmp.ne.s32.totalorder %s1695_s13, 0 }
  0x4a   : > { %1601 = vsyncadd (%p1950_p5), [#allocation6], 4294966272 }
  0x4b   : > { %s406_s15 = scalar_select %p405_p6, %s1695_s13, 1 }
  0x4c   : > { %429 = sbr.rel (%p1951_p8) target bundleno = 83 (0x53), region = 60 }
  0x4d   : > { %s1789_s19 = sshll.u32 %s406_s15, 3  ;;  %s1234_s17 = sshll.u32 %s406_s15, 2 }
  0x4e   : > { %s408_s20 = scalar_lea.vmem %s1926_s1, %s1789_s19  ;;  %s412_s30 = scalar_lea.vmem %s1927_s2, %s1789_s19 }
  0x4f   : > { %s1802_s18 = scalar_lea.vmem %s1929_s4, %s1234_s17  ;;  %s420_s24 = scalar_lea.vmem %s1932_s7, %s1789_s19 }
  0x50   : > { %s424_s15 = scalar_lea.vmem %s1933_s8, %s1789_s19 }
  0x51   : > { %v430_v0 = vld [vmem:[%s1925_s0] sm:$0xff] }
  0x52   : > { %431 = vst [vmem:[#allocation2] sm:$0xff] %v430_v0 }
  0x53 PF: > { %v1404_v1 = vld [vmem:[%s1777_s26 + $0xe4] ss:$16 sps:$4 sm:$0xff]   ;;  %v1406_v2 = vld [vmem:[%s1777_s26 + $0xe0] ss:$16 sps:$4 sm:$0xff]   ;;  %v1415_v6 = vld [vmem:[%s1777_s26 + $0xec] ss:$16 sps:$4 sm:$0xff]  }
  0x54   : > { %843 = vmatprep.subr.bf16.mxu0 %v1404_v1  ;;  %v1407_v3 = vld [vmem:[%s1777_s26 + $0xc4] ss:$16 sps:$4 sm:$0xff]   ;;  %v1409_v4 = vld [vmem:[%s1777_s26 + $0xc0] ss:$16 sps:$4 sm:$0xff]   ;;  %v1418_v7 = vld [vmem:[%s1777_s26 + $0xe8] ss:$16 sps:$4 sm:$0xff]   ;;  %884 = vmatprep.subr.bf16.mxu1 %v1415_v6 }
  0x55   : > { %844 = vmatpush1.bf16.msra.mxu0 %v1406_v2  ;;  %v1410_v5 = vld [vmem:[%s1777_s26 + $0xa4] ss:$16 sps:$4 sm:$0xff]   ;;  %v1412_v8 = vld [vmem:[%s1777_s26 + $0xa0] ss:$16 sps:$4 sm:$0xff]   ;;  %885 = vmatpush1.bf16.msra.mxu1 %v1418_v7  ;;  %v1421_v10 = vld [vmem:[%s1777_s26 + $0xcc] ss:$16 sps:$4 sm:$0xff]  }
  0x56   : > { %845 = vmatprep.subr.bf16.mxu0 %v1407_v3  ;;  %v1413_v9 = vld [vmem:[%s1777_s26 + $0x84] ss:$16 sps:$4 sm:$0xff]   ;;  %v1424_v11 = vld [vmem:[%s1777_s26 + $0xc8] ss:$16 sps:$4 sm:$0xff]   ;;  %886 = vmatprep.subr.bf16.mxu1 %v1421_v10  ;;  %v1417_v12 = vld [vmem:[%s1777_s26 + $0x80] ss:$16 sps:$4 sm:$0xff]  }
  0x57   : > { %v1419_v13 = vld [vmem:[%s1777_s26 + $0x64] ss:$16 sps:$4 sm:$0xff]   ;;  %v1427_v14 = vld [vmem:[%s1777_s26 + $0xac] ss:$16 sps:$4 sm:$0xff]   ;;  %v1430_v15 = vld [vmem:[%s1777_s26 + $0xa8] ss:$16 sps:$4 sm:$0xff]  }
  0x58   : > { %v1433_v16 = vld [vmem:[%s1777_s26 + $0x8c] ss:$16 sps:$4 sm:$0xff]   ;;  %v1423_v17 = vld [vmem:[%s1777_s26 + $0x60] ss:$16 sps:$4 sm:$0xff]   ;;  %v1425_v18 = vld [vmem:[%s1777_s26 + $0x44] ss:$16 sps:$4 sm:$0xff]  }
  0x59   : > { %846 = vmatpush1.bf16.msra.mxu0 %v1409_v4  ;;  %887 = vmatpush1.bf16.msra.mxu1 %v1424_v11  ;;  %v1436_v19 = vld [vmem:[%s1777_s26 + $0x88] ss:$16 sps:$4 sm:$0xff]   ;;  %v1439_v20 = vld [vmem:[%s1777_s26 + $0x6c] ss:$16 sps:$4 sm:$0xff]   ;;  %v1429_v21 = vld [vmem:[%s1777_s26 + $0x40] ss:$16 sps:$4 sm:$0xff]  }
  0x5a   : > { %847 = vmatprep.subr.bf16.mxu0 %v1410_v5  ;;  %888 = vmatprep.subr.bf16.mxu1 %v1427_v14  ;;  %v1431_v22 = vld [vmem:[%s1777_s26 + $0x24] ss:$16 sps:$4 sm:$0xff]   ;;  %v1442_v23 = vld [vmem:[%s1777_s26 + $0x68] ss:$16 sps:$4 sm:$0xff]   ;;  %v1445_v24 = vld [vmem:[%s1777_s26 + $0x4c] ss:$16 sps:$4 sm:$0xff]   ;;  %v503_v5 = vlaneseq }
  0x5b   : > { %v1435_v25 = vld [vmem:[%s1777_s26 + $0x20] ss:$16 sps:$4 sm:$0xff]   ;;  %v1437_v26 = vld [vmem:[%s1777_s26 + $0x4] ss:$16 sps:$4 sm:$0xff]   ;;  %v1448_v27 = vld [vmem:[%s1777_s26 + $0x48] ss:$16 sps:$4 sm:$0xff]  }
  0x5c   : > { %v1451_v28 = vld [vmem:[%s1777_s26 + $0x2c] ss:$16 sps:$4 sm:$0xff]   ;;  %v1441_v29 = vld [vmem:[%s1777_s26] ss:$16 sps:$4 sm:$0xff]   ;;  %v1443_v30 = vld [vmem:[%s1777_s26 + $0x1e4] ss:$16 sps:$4 sm:$0xff]  }
  0x5d   : > { %848 = vmatpush1.bf16.msra.mxu0 %v1412_v8  ;;  %889 = vmatpush1.bf16.msra.mxu1 %v1430_v15  ;;  %v1454_v31 = vld [vmem:[%s1777_s26 + $0x28] ss:$16 sps:$4 sm:$0xff]   ;;  %v1457_v32 = vld [vmem:[%s1777_s26 + $0xc] ss:$16 sps:$4 sm:$0xff]   ;;  %v1447_v33 = vld [vmem:[%s1777_s26 + $0x1e0] ss:$16 sps:$4 sm:$0xff]  }
  0x5e   : > { %849 = vmatprep.subr.bf16.mxu0 %v1413_v9  ;;  %890 = vmatprep.subr.bf16.mxu1 %v1433_v16  ;;  %v1449_v34 = vld [vmem:[%s1777_s26 + $0x1c4] ss:$16 sps:$4 sm:$0xff]   ;;  %v1460_v35 = vld [vmem:[%s1777_s26 + $0x8] ss:$16 sps:$4 sm:$0xff]   ;;  %v1463_v36 = vld [vmem:[%s1777_s26 + $0x1ec] ss:$16 sps:$4 sm:$0xff]  }
  0x5f   : > { %v1453_v37 = vld [vmem:[%s1777_s26 + $0x1c0] ss:$16 sps:$4 sm:$0xff]   ;;  %v1455_v38 = vld [vmem:[%s1777_s26 + $0x1a4] ss:$16 sps:$4 sm:$0xff]   ;;  %v1466_v39 = vld [vmem:[%s1777_s26 + $0x1e8] ss:$16 sps:$4 sm:$0xff]  }
  0x60   : > { %v1469_v40 = vld [vmem:[%s1777_s26 + $0x1cc] ss:$16 sps:$4 sm:$0xff]   ;;  %v1459_v42 = vld [vmem:[%s1777_s26 + $0x1a0] ss:$16 sps:$4 sm:$0xff]   ;;  %v1461_v44 = vld [vmem:[%s1777_s26 + $0x184] ss:$16 sps:$4 sm:$0xff]  }
  0x61   : > { %850 = vmatpush1.bf16.msra.mxu0 %v1417_v12  ;;  %891 = vmatpush1.bf16.msra.mxu1 %v1436_v19  ;;  %v432_v41 = vld [vmem:[%s408_s20] sm:$0xff]  ;;  %v1465_v47 = vld [vmem:[%s1777_s26 + $0x180] ss:$16 sps:$4 sm:$0xff]   ;;  %v1467_v48 = vld [vmem:[%s1777_s26 + $0x164] ss:$16 sps:$4 sm:$0xff]   ;;  %s951_s20 = sadd.s32 1, %s1695_s13 }
  0x62   : > { %851 = vmatprep.subr.bf16.mxu0 %v1419_v13  ;;  %892 = vmatprep.subr.bf16.mxu1 %v1439_v20  ;;  %v436_v43 = vpack.c.bf16 %v432_v41, %v432_v41  ;;  %v1472_v45 = vld [vmem:[%s1777_s26 + $0x1c8] ss:$16 sps:$4 sm:$0xff]   ;;  %v1475_v46 = vld [vmem:[%s1777_s26 + $0x1ac] ss:$16 sps:$4 sm:$0xff]   ;;  %v1471_v51 = vld [vmem:[%s1777_s26 + $0x160] ss:$16 sps:$4 sm:$0xff]  }
  0x63   : > { %v1478_v49 = vld [vmem:[%s1777_s26 + $0x1a8] ss:$16 sps:$4 sm:$0xff]   ;;  %v1481_v50 = vld [vmem:[%s1777_s26 + $0x18c] ss:$16 sps:$4 sm:$0xff]   ;;  %v1473_v52 = vld [vmem:[%s1777_s26 + $0x144] ss:$16 sps:$4 sm:$0xff]  }
  0x64   : > { %875 = vmatprep.mubr.bf16.mxu0 %v436_v43  ;;  %916 = vmatprep.mubr.bf16.mxu1 %v436_v43  ;;  %v1484_v53 = vld [vmem:[%s1777_s26 + $0x188] ss:$16 sps:$4 sm:$0xff]   ;;  %v1487_v54 = vld [vmem:[%s1777_s26 + $0x16c] ss:$16 sps:$4 sm:$0xff]   ;;  %v1477_v55 = vld [vmem:[%s1777_s26 + $0x140] ss:$16 sps:$4 sm:$0xff]  }
  0x65   : > { %852 = vmatpush1.bf16.msra.mxu0 %v1423_v17  ;;  %893 = vmatpush1.bf16.msra.mxu1 %v1442_v23  ;;  %v1479_v56 = vld [vmem:[%s1777_s26 + $0x124] ss:$16 sps:$4 sm:$0xff]   ;;  %v1490_v57 = vld [vmem:[%s1777_s26 + $0x168] ss:$16 sps:$4 sm:$0xff]   ;;  %v1491_v58 = vld [vmem:[%s1777_s26 + $0x14c] ss:$16 sps:$4 sm:$0xff]  }
  0x66   : > { %853 = vmatprep.subr.bf16.mxu0 %v1425_v18  ;;  %894 = vmatprep.subr.bf16.mxu1 %v1445_v24  ;;  %v1483_v59 = vld [vmem:[%s1777_s26 + $0x120] ss:$16 sps:$4 sm:$0xff]   ;;  %v1485_v60 = vld [vmem:[%s1777_s26 + $0x104] ss:$16 sps:$4 sm:$0xff]   ;;  %v1493_v61 = vld [vmem:[%s1777_s26 + $0x148] ss:$16 sps:$4 sm:$0xff]  }
  0x67   : > { %v1494_v62 = vld [vmem:[%s1777_s26 + $0x12c] ss:$16 sps:$4 sm:$0xff]   ;;  %v1489_v63 = vld [vmem:[%s1777_s26 + $0x100] ss:$16 sps:$4 sm:$0xff]   ;;  %v1496_v1 = vld [vmem:[%s1777_s26 + $0x128] ss:$16 sps:$4 sm:$0xff]  }
  0x68   : > { %v434_v0 = vld [vmem:[#allocation2] sm:$0xff]  ;;  %v504_v6 = vshrl.u32 %v503_v5, 7  ;;  %p1305_p3 = scmp.ge.s32.totalorder %s951_s20, 2 }
  0x69   : > { %854 = vmatpush1.bf16.msra.mxu0 %v1429_v21  ;;  %895 = vmatpush1.bf16.msra.mxu1 %v1448_v27  ;;  %v1497_v2 = vld [vmem:[%s1777_s26 + $0x10c] ss:$16 sps:$4 sm:$0xff]   ;;  %v435_v3 = vpack.c.bf16 %v434_v0, %v434_v0  ;;  %v1499_v4 = vld [vmem:[%s1777_s26 + $0x108] ss:$16 sps:$4 sm:$0xff]  }
  0x6a   : > { %855 = vmatprep.subr.bf16.mxu0 %v1431_v22  ;;  %896 = vmatprep.subr.bf16.mxu1 %v1451_v28  ;;  %v505_v7 = vsub.s32 0, %v504_v6  ;;  %v501_v8 = vld [vmem:[%s1802_s18] sm:$0xf]  ;;  %v509_v9 = vsub.s32 1, %v504_v6  ;;  %v517_v18 = vsub.s32 3, %v504_v6  ;;  %v513_v22 = vsub.s32 2, %v504_v6 }
  0x6c   : > { %v506_v10 = vrot.slane %v501_v8, %v505_v7  ;;  %v510_v11 = vrot.slane %v501_v8, %v509_v9  ;;  %v518_v24 = vrot.slane %v501_v8, %v517_v18 }
  0x6d   : > { %856 = vmatpush1.bf16.msra.mxu0 %v1435_v25  ;;  %897 = vmatpush1.bf16.msra.mxu1 %v1454_v31 }
  0x6e   : > { %857 = vmatprep.subr.bf16.mxu0 %v1437_v26  ;;  %898 = vmatprep.subr.bf16.mxu1 %v1457_v32  ;;  %v514_v26 = vrot.slane %v501_v8, %v513_v22 }
  0x71   : > { %858 = vmatpush1.bf16.msra.mxu0 %v1441_v29  ;;  %899 = vmatpush1.bf16.msra.mxu1 %v1460_v35 }
  0x72   : > { %859 = vmatprep.subr.bf16.mxu0 %v1443_v30  ;;  %900 = vmatprep.subr.bf16.mxu1 %v1463_v36 }
  0x75   : > { %860 = vmatpush2.bf16.msra.mxu0 %v1447_v33  ;;  %901 = vmatpush2.bf16.msra.mxu1 %v1466_v39 }
  0x76   : > { %861 = vmatprep.subr.bf16.mxu0 %v1449_v34  ;;  %902 = vmatprep.subr.bf16.mxu1 %v1469_v40 }
  0x79   : > { %862 = vmatpush2.bf16.msra.mxu0 %v1453_v37  ;;  %903 = vmatpush2.bf16.msra.mxu1 %v1472_v45 }
  0x7a   : > { %863 = vmatprep.subr.bf16.mxu0 %v1455_v38  ;;  %904 = vmatprep.subr.bf16.mxu1 %v1475_v46  ;;  %v433_v38 = vld [vmem:[%s412_s30] sm:$0xff] }
  0x7d   : > { %864 = vmatpush2.bf16.msra.mxu0 %v1459_v42  ;;  %905 = vmatpush2.bf16.msra.mxu1 %v1478_v49 }
  0x7e   : > { %865 = vmatprep.subr.bf16.mxu0 %v1461_v44  ;;  %906 = vmatprep.subr.bf16.mxu1 %v1481_v50 }
  0x81   : > { %866 = vmatpush2.bf16.msra.mxu0 %v1465_v47  ;;  %907 = vmatpush2.bf16.msra.mxu1 %v1484_v53 }
  0x82   : > { %867 = vmatprep.subr.bf16.mxu0 %v1467_v48  ;;  %908 = vmatprep.subr.bf16.mxu1 %v1487_v54 }
  0x85   : > { %868 = vmatpush2.bf16.msra.mxu0 %v1471_v51  ;;  %909 = vmatpush2.bf16.msra.mxu1 %v1490_v57 }
  0x86   : > { %869 = vmatprep.subr.bf16.mxu0 %v1473_v52  ;;  %910 = vmatprep.subr.bf16.mxu1 %v1491_v58 }
  0x89   : > { %870 = vmatpush2.bf16.msra.mxu0 %v1477_v55  ;;  %911 = vmatpush2.bf16.msra.mxu1 %v1493_v61 }
  0x8a   : > { %871 = vmatprep.subr.bf16.mxu0 %v1479_v56  ;;  %912 = vmatprep.subr.bf16.mxu1 %v1494_v62 }
  0x8d   : > { %872 = vmatpush2.bf16.msra.mxu0 %v1483_v59  ;;  %913 = vmatpush2.bf16.msra.mxu1 %v1496_v1 }
  0x8e   : > { %873 = vmatprep.subr.bf16.mxu0 %v1485_v60  ;;  %914 = vmatprep.subr.bf16.mxu1 %v1497_v2 }
  0x91   : > { %874 = vmatpush2.bf16.msra.mxu0 %v1489_v63  ;;  %915 = vmatpush2.bf16.msra.mxu1 %v1499_v4 }
  0x94   : > { %876 = vmatmul.mubr.bf16.vlgmr.msra.gmra.mxu0 %v435_v3  ;;  %917 = vmatmul.mubr.bf16.vlgmr.msra.gmra.mxu1 %v435_v3 }
 0x154   : > { %v877_v12 = vpop.f32.mrf.mxu0  ;;  %v918_v20 = vpop.f32.mrf.mxu1 }
 0x155   : > { %v878_v13 = vadd.f32 %v877_v12, %v506_v10  ;;  %v919_v29 = vadd.f32 %v918_v20, %v514_v26 }
 0x156   : > { %v879_v14 = vpop.f32.mrf.mxu0  ;;  %v920_v23 = vpop.f32.mrf.mxu1 }
 0x157   : > { %v1302_v15 = vmul.f32 -1.442695, %v878_v13  ;;  %v880_v16 = vadd.f32 %v879_v14, %v510_v11  ;;  %v921_v28 = vadd.f32 %v920_v23, %v518_v24 }
 0x158   : > { %v881_v17 = vpop.f32.mrf.mxu0  ;;  %v922_v25 = vpop.f32.mrf.mxu1 }
 0x159   : > { %1500 = vpow2.f32 %v1302_v15  ;;  %v1303_v19 = vmul.f32 -1.442695, %v880_v16  ;;  %v1304_v30 = vmul.f32 -1.442695, %v921_v28 }
 0x15a   : > { %v882_v21 = vpop.f32.mrf.mxu0  ;;  %v923_v27 = vpop.f32.mrf.mxu1 }
 0x15b   : > { %1502 = vpow2.f32 %v1303_v19 }
 0x15c   : > { %1504 = vtanh.f32 %v919_v29 }
 0x15d   : > { %1506 = vpow2.f32 %v1304_v30 }
 0x166   : > { %v1501_v31 = vpop.eup %1500 }
 0x167   : > { %v928_v32 = vadd.f32 1.0, %v1501_v31 }
 0x168   : > { %v1503_v33 = vpop.eup %1502 }
 0x169   : > { %1508 = vrcp.f32 %v928_v32  ;;  %v934_v34 = vadd.f32 1.0, %v1503_v33  ;;  %v1505_v35 = vpop.eup %1504 }
 0x16a   : > { %v1507_v36 = vpop.eup %1506 }
 0x16b   : > { %1510 = vrcp.f32 %v934_v34  ;;  %v941_v40 = vadd.f32 1.0, %v1507_v36 }
 0x16d   : > { %1512 = vrcp.f32 %v941_v40 }
 0x176   : > { %v1509_v37 = vpop.eup %1508 }
 0x177   : > { %v945_v42 = vmul.f32 %v1509_v37, %v1505_v35 }
 0x178   : > { %v1511_v39 = vpop.eup %1510 }
 0x179   : > { %v944_v41 = vmul.f32 %v1511_v39, %v433_v38 }
 0x17a   : > { %v1513_v44 = vpop.eup %1512 }
 0x17b   : > { %v946_v43 = vadd.f32 %v945_v42, %v944_v41 }
 0x17d   : > { %1514 = vtanh.f32 %v946_v43  ;;  %950 = vst [vmem:[%s424_s15] sm:$0xff] %v946_v43 }
 0x189   : > { %955 = sbr.rel (%p1305_p3) target bundleno = 399 (0x18f), region = 64 }
 0x18a   : > { %v1515_v45 = vpop.eup %1514 }
 0x18b   : > { %v948_v46 = vmul.f32 %v1515_v45, %v1513_v44 }
 0x18d   : > { %949 = vst [vmem:[%s420_s24] sm:$0xff] %v948_v46 }
 0x18e   : > { %956 = vst [vmem:[#allocation2] sm:$0xff] %v948_v46 }
 0x18f PF: > { %p1306_p7 = scmp.ne.s32.totalorder %s1695_s13, 1 }
 0x191   : > { %960 = sbr.rel (%p1306_p7) target bundleno = 638 (0x27e), region = 68 }
 0x196   : > { %v1516_v47 = vld [vmem:[#allocation5 + $0x38] sm:$0xff]   ;;  %v1624_v48 = vmov 0.0   ;;  %v1517_v49 = vld [vmem:[#allocation5 + $0x30] sm:$0xff]   ;;  %vm1625_vm0 = vmmov 0   ;;  %v1518_v50 = vld [vmem:[#allocation5 + $0x28] sm:$0xff]   ;;  %v961_v56 = vpack.c.bf16 %v948_v46, %v948_v46 }
 0x197   : > { %1328 = vmatprep.subr.bf16.mxu0 %v1624_v48  ;;  %1344 = vmatprep.mubr.msk.bf16.mxu0 %vm1625_vm0, %v1624_v48  ;;  %v1519_v51 = vld [vmem:[#allocation5 + $0x20] sm:$0xff]   ;;  %v1520_v52 = vld [vmem:[#allocation5 + $0x18] sm:$0xff]   ;;  %v1521_v53 = vld [vmem:[#allocation5 + $0x10] sm:$0xff]  }
 0x198   : > { %1329 = vmatpush3.bf16.msra.mxu0 %v1516_v47  ;;  %v1522_v54 = vld [vmem:[#allocation5 + $0x8] sm:$0xff]   ;;  %v1523_v55 = vld [vmem:[#allocation5] sm:$0xff]   ;;  %v1307_v57 = vld [vmem:[%s1931_s6] ss:$0 sm:$0xff] }
 0x199   : > { %1330 = vmatprep.subr.bf16.mxu0 %v1624_v48 }
 0x19c   : > { %1331 = vmatpush3.bf16.msra.mxu0 %v1517_v49 }
 0x19d   : > { %1332 = vmatprep.subr.bf16.mxu0 %v1624_v48 }
 0x1a0   : > { %1333 = vmatpush3.bf16.msra.mxu0 %v1518_v50 }
 0x1a1   : > { %1334 = vmatprep.subr.bf16.mxu0 %v1624_v48 }
 0x1a4   : > { %1335 = vmatpush3.bf16.msra.mxu0 %v1519_v51 }
 0x1a5   : > { %1336 = vmatprep.subr.bf16.mxu0 %v1624_v48 }
 0x1a8   : > { %1337 = vmatpush3.bf16.msra.mxu0 %v1520_v52 }
 0x1a9   : > { %1338 = vmatprep.subr.bf16.mxu0 %v1624_v48 }
 0x1ac   : > { %1339 = vmatpush3.bf16.msra.mxu0 %v1521_v53 }
 0x1ad   : > { %1340 = vmatprep.subr.bf16.mxu0 %v1624_v48 }
 0x1b0   : > { %1341 = vmatpush3.bf16.msra.mxu0 %v1522_v54 }
 0x1b1   : > { %1342 = vmatprep.subr.bf16.mxu0 %v1624_v48 }
 0x1b4   : > { %1343 = vmatpush3.bf16.msra.mxu0 %v1523_v55 }
 0x1b7   : > { %1345 = vmatmul.mubr.bf16.vlgmr.msra.gmra.mxu0 %v961_v56 }
 0x277   : > { %v1067_v58 = vpop.f32.mrf.mxu0 }
 0x278   : > { %v1068_v59 = vadd.f32 %v1307_v57, %v1067_v58 }
 0x279   : > { %v1346_v60 = vpop.f32.mrf.mxu0 }
 0x27a   : > { %1073 = vst [vmem:[%s1934_s9] sm:$0xff] %v1068_v59 }
 0x27b   : > { %v1070_v61 = vpop.f32.mrf.mxu0 }
 0x27d   : > { %v1347_v62 = vpop.f32.mrf.mxu0 }
 0x27e PF: > { %s1952_s12 = sld [smem:[#allocation9_spill]]  ;;  %s1953_s30 = smov %s1608_s10 }
 0x27f   : > { %s1954_s10 = smov %s1612_s11  ;;  %s1955_s11 = smov %s1738_s27 }
 0x284   : > { %p21_p9 = scmp.ge.s32.totalorder %s1952_s12, 4  }
 0x286   :  { %23 = sbr.rel (!%p21_p9) target bundleno = 6 (0x6), region = 133 }
 0x28b   :  { %1113 = vsyncpa [#allocation4], 1 }
 0x28c   :  { %1115 = vsyncpa [#allocation4 + $0x1], 1 }
 0x28d   :  { %1116 = vsyncpa [#allocation6], 1 }

</bundles_post_ra>
